<compile_context>
chip_gen: v6e
topology: v6e:2x2x1
jax: 0.10.0
libtpu: 0.0.40
codegen_flags: <defaults>
</compile_context>

<pallas_src>
import functools

import jax
import jax.numpy as jnp
import numpy as np
from jax.experimental import pallas as pl
from jax.experimental.pallas import tpu as pltpu

MAX_TL = 32768   # particles (lanes) per grid step; multiple of 128


def _ce_stats_kernel(logits_ref, labels_ref, stats_ref, *, n_total, tl):
    """One tile of particles -> per-class [loss_sum, label_count, correct_count]."""
    i = pl.program_id(0)

    x = logits_ref[...].astype(jnp.float32)      # (C, TL): classes on sublanes, particles on lanes
    lab = labels_ref[...]                        # (1, TL) int32

    # Mask the ragged last tile: out-of-range lanes behave like ignore_index (-1).
    pidx = i * tl + jax.lax.broadcasted_iota(jnp.int32, lab.shape, 1)
    lab = jnp.where(pidx < n_total, lab, -1)

    cls = jax.lax.broadcasted_iota(jnp.int32, x.shape, 0)     # class id per sublane
    is_label = cls == lab                                     # (C, TL); all-False where lab == -1
    valid = lab >= 0                                          # (1, TL); ignore_index = -1

    # Numerically stable log-softmax pieces (class reductions = short sublane reductions).
    cmax = jnp.max(x, axis=0, keepdims=True)                                   # (1, TL)
    lse = cmax + jnp.log(jnp.sum(jnp.exp(x - cmax), axis=0, keepdims=True))    # (1, TL)
    x_at_label = jnp.sum(jnp.where(is_label, x, 0.0), axis=0, keepdims=True)   # (1, TL)
    per_loss = jnp.where(valid, lse - x_at_label, 0.0)                         # (1, TL)

    # First-max argmax over classes (matches torch/np tie-breaking).
    nclass = x.shape[0]
    argmax = jnp.min(jnp.where(x == cmax, cls, nclass), axis=0, keepdims=True)
    correct = argmax == lab                                   # (1, TL); lab == -1 never matches

    # Per-class partial sums over this tile's particles (lane reductions), assembled in
    # registers and written with a single store into this step's own (C, 3) output block
    # -> the grid axis stays fully parallel (no shared accumulator).
    loss_col = jnp.sum(jnp.where(is_label, per_loss, 0.0), axis=1, keepdims=True)           # (C, 1)
    count_col = jnp.sum(is_label.astype(jnp.float32), axis=1, keepdims=True)                # (C, 1)
    correct_col = jnp.sum(jnp.where(is_label & correct, 1.0, 0.0), axis=1, keepdims=True)   # (C, 1)
    stats_ref[...] = jnp.concatenate([loss_col, count_col, correct_col], axis=1)            # (C, 3)


def _ce_stats(logits_t, labels_t):
    """logits_t: (C, N) float; labels_t: (1, N) int32  ->  (steps, C, 3) partial stats."""
    c, n = logits_t.shape
    # Lane tile: multiple of 128, ~N/2 so v7x's two TensorCores each get >=1 step when N
    # allows, capped so per-step DMA stays <= ~0.75 MiB and double-buffered VMEM ~4 MiB.
    tl = min(MAX_TL, max(128, pl.cdiv(pl.cdiv(n, 2), 128) * 128))
    steps = pl.cdiv(n, tl)
    kernel = functools.partial(_ce_stats_kernel, n_total=n, tl=tl)
    return pl.pallas_call(
        kernel,
        out_shape=jax.ShapeDtypeStruct((steps, c, 3), jnp.float32),
        grid_spec=pltpu.PrefetchScalarGridSpec(
            num_scalar_prefetch=0,
            grid=(steps,),
            in_specs=[
                pl.BlockSpec((c, tl), lambda i: (0, i)),   # lane-dense logits slab
                pl.BlockSpec((1, tl), lambda i: (0, i)),   # labels
            ],
            out_specs=pl.BlockSpec((None, c, 3), lambda i: (i, 0, 0)),
        ),
        compiler_params=pltpu.CompilerParams(dimension_semantics=("parallel",)),
    )(logits_t, labels_t)


@jax.jit
def _particle_type_loss_impl(logits, labels):
    """Whole forward in one dispatch: layout plumbing + kernel + fused epilogue."""
    n, _ = logits.shape
    # Layout plumbing only: classes -> sublanes, particles -> lanes (lane-dense stream).
    logits_t = jnp.transpose(logits)          # (C, N)
    labels_t = labels.reshape(1, n)           # (1, N)

    stats = _ce_stats(logits_t, labels_t)     # (steps, C, 3)
    totals = jnp.sum(stats, axis=0)           # (C, 3)

    # Mean CE over non-ignored labels, like nn.CrossEntropyLoss(ignore_index=-1).
    # NOTE: 0/0 -> NaN if every label is ignored (matches torch behavior).
    loss = jnp.sum(totals[:, 0]) / jnp.sum(totals[:, 1])
    # Accuracy divides by all rows (including ignored), like the original torch module.
    accuracy = jnp.sum(totals[:, 2]) / n
    return loss, accuracy, totals


class ParticleTypeLoss:
    """JAX/Pallas port of mlreco ParticleTypeLoss (no learnable params)."""

    def __init__(self, cfg=None, name='particle_type_loss', compute_per_class_accuracy=False):
        self.ignore_index = -1
        # The original torch module builds (but never returns) per-class accuracies; that
        # host loop forces a device sync, so it stays off the hot path behind this flag.
        self.compute_per_class_accuracy = compute_per_class_accuracy

    def forward(self, out, type_labels):
        logits = jnp.asarray(out['logits'][0])                   # (N, C), native float dtype
        if not jnp.issubdtype(logits.dtype, jnp.floating):
            logits = logits.astype(jnp.float32)
        labels = jnp.asarray(type_labels[0][:, 0], jnp.int32)    # (N,)

        loss, accuracy, totals = _particle_type_loss_impl(logits, labels)
        res = {'loss': loss, 'accuracy': accuracy}

        if self.compute_per_class_accuracy:
            # Host sync happens only here; the original module computes these but never
            # returns them, so they are likewise not added to `res`.
            c = logits.shape[1]
            totals_np = np.asarray(totals)
            labels_np = np.asarray(labels)
            acc_types = {}
            for cc in np.unique(labels_np):
                cc = int(cc)
                mask_count = float(np.sum(labels_np == cc))
                correct_c = float(totals_np[cc, 2]) if 0 <= cc < c else 0.0
                acc_types['accuracy_{}'.format(cc)] = correct_c / mask_count
        return res


if __name__ == "__main__":
    key = jax.random.PRNGKey(0)
    k1, k2 = jax.random.split(key)

    N, C = 100, 5
    logits = jax.random.normal(k1, (N, C), dtype=jnp.float32)
    labels = jax.random.randint(k2, (N,), -1, C)                      # includes ignore_index -1
    type_labels = [jnp.stack([labels, jnp.zeros_like(labels)], axis=1)]  # column 0 = type label
    out = {'logits': [logits]}

    module = ParticleTypeLoss(cfg=None)
    res = module.forward(out, type_labels)
    jax.block_until_ready(res['loss'])

    # Pure-numpy reference check
    logits_np = np.asarray(logits, np.float64)
    labels_np = np.asarray(labels)
    valid = labels_np >= 0
    row_max = logits_np.max(axis=1, keepdims=True)
    lse = (row_max + np.log(np.exp(logits_np - row_max).sum(axis=1, keepdims=True)))[:, 0]
    gathered = logits_np[np.arange(N), np.clip(labels_np, 0, C - 1)]
    ref_loss = float(np.mean((lse - gathered)[valid]))
    pred = np.argmax(logits_np, axis=1)
    ref_acc = float(np.sum(pred == labels_np)) / float(N)

    assert abs(float(res['loss']) - ref_loss) < 1e-4, (float(res['loss']), ref_loss)
    assert abs(float(res['accuracy']) - ref_acc) < 1e-6, (float(res['accuracy']), ref_acc)

    print("KERNEL_OK")
</pallas_src>

<mosaic_0001>
module attributes {stable_mosaic.version = 11 : i64} {
  func.func @_ce_stats_kernel(%arg0: i32, %arg1: memref<5x128xf32, #tpu.memory_space<vmem>>, %arg2: memref<1x128xi32, #tpu.memory_space<vmem>>, %arg3: memref<1x5x3xf32, #tpu.memory_space<vmem>>) attributes {dimension_semantics = [#tpu.dimension_semantics<parallel>], iteration_bounds = array<i64: 1>, scalar_prefetch = 0 : i64, scratch_operands = 0 : i64, tpu.core_type = #tpu.core_type<tc>, window_params = [{transform_indices = @transform_0, window_bounds = array<i64: 5, 128>}, {transform_indices = @transform_1, window_bounds = array<i64: 1, 128>}, {transform_indices = @transform_2, window_bounds = array<i64: 1, 5, 3>}]} {
    %c0 = arith.constant 0 : index
    %c0_0 = arith.constant 0 : index
    %0 = vector.load %arg1[%c0, %c0_0] : memref<5x128xf32, #tpu.memory_space<vmem>>, vector<5x128xf32>
    %c0_1 = arith.constant 0 : index
    %c0_2 = arith.constant 0 : index
    %1 = vector.load %arg2[%c0_1, %c0_2] : memref<1x128xi32, #tpu.memory_space<vmem>>, vector<1x128xi32>
    %c128_i32 = arith.constant 128 : i32
    %2 = arith.muli %arg0, %c128_i32 : i32
    %3 = tpu.iota {dimensions = array<i32: 1>} : vector<1x128xi32>
    %4 = vector.broadcast %2 : i32 to vector<1x128xi32>
    %5 = arith.addi %4, %3 : vector<1x128xi32>
    %c100_i32 = arith.constant 100 : i32
    %6 = vector.broadcast %c100_i32 : i32 to vector<1x128xi32>
    %7 = arith.cmpi slt, %5, %6 : vector<1x128xi32>
    %c-1_i32 = arith.constant -1 : i32
    %8 = vector.broadcast %c-1_i32 : i32 to vector<1x128xi32>
    %9 = arith.select %7, %1, %8 : vector<1x128xi1>, vector<1x128xi32>
    %10 = tpu.iota {dimensions = array<i32: 0>} : vector<5x128xi32>
    %11 = vector.broadcast %9 : vector<1x128xi32> to vector<5x128xi32>
    %12 = arith.cmpi eq, %10, %11 : vector<5x128xi32>
    %c0_i32 = arith.constant 0 : i32
    %13 = vector.broadcast %c0_i32 : i32 to vector<1x128xi32>
    %14 = arith.cmpi sge, %9, %13 : vector<1x128xi32>
    %cst = arith.constant dense<0xFF800000> : vector<128xf32>
    %15 = vector.multi_reduction <maximumf>, %0, %cst [0] : vector<5x128xf32> to vector<128xf32>
    %16 = vector.shape_cast %15 : vector<128xf32> to vector<1x128xf32>
    %17 = vector.broadcast %16 : vector<1x128xf32> to vector<5x128xf32>
    %18 = arith.subf %0, %17 : vector<5x128xf32>
    %19 = math.exp %18 : vector<5x128xf32>
    %cst_3 = arith.constant dense<0.000000e+00> : vector<128xf32>
    %20 = vector.multi_reduction <add>, %19, %cst_3 [0] : vector<5x128xf32> to vector<128xf32>
    %21 = vector.shape_cast %20 : vector<128xf32> to vector<1x128xf32>
    %22 = math.log %21 : vector<1x128xf32>
    %23 = arith.addf %16, %22 : vector<1x128xf32>
    %cst_4 = arith.constant 0.000000e+00 : f32
    %24 = vector.broadcast %cst_4 : f32 to vector<5x128xf32>
    %25 = arith.select %12, %0, %24 : vector<5x128xi1>, vector<5x128xf32>
    %cst_5 = arith.constant dense<0.000000e+00> : vector<128xf32>
    %26 = vector.multi_reduction <add>, %25, %cst_5 [0] : vector<5x128xf32> to vector<128xf32>
    %27 = vector.shape_cast %26 : vector<128xf32> to vector<1x128xf32>
    %28 = arith.subf %23, %27 : vector<1x128xf32>
    %cst_6 = arith.constant 0.000000e+00 : f32
    %29 = vector.broadcast %cst_6 : f32 to vector<1x128xf32>
    %30 = arith.select %14, %28, %29 : vector<1x128xi1>, vector<1x128xf32>
    %31 = vector.broadcast %16 : vector<1x128xf32> to vector<5x128xf32>
    %32 = arith.cmpf oeq, %0, %31 : vector<5x128xf32>
    %c5_i32 = arith.constant 5 : i32
    %33 = vector.broadcast %c5_i32 : i32 to vector<5x128xi32>
    %34 = arith.select %32, %10, %33 : vector<5x128xi1>, vector<5x128xi32>
    %cst_7 = arith.constant dense<2147483647> : vector<128xi32>
    %35 = vector.multi_reduction <minsi>, %34, %cst_7 [0] : vector<5x128xi32> to vector<128xi32>
    %36 = vector.shape_cast %35 : vector<128xi32> to vector<1x128xi32>
    %37 = arith.cmpi eq, %36, %9 : vector<1x128xi32>
    %cst_8 = arith.constant 0.000000e+00 : f32
    %38 = vector.shape_cast %30 : vector<1x128xf32> to vector<1x128xf32>
    %39 = vector.broadcast %38 : vector<1x128xf32> to vector<5x128xf32>
    %40 = vector.broadcast %cst_8 : f32 to vector<5x128xf32>
    %41 = arith.select %12, %39, %40 : vector<5x128xi1>, vector<5x128xf32>
    %cst_9 = arith.constant dense<0.000000e+00> : vector<5xf32>
    %42 = vector.multi_reduction <add>, %41, %cst_9 [1] : vector<5x128xf32> to vector<5xf32>
    %43 = vector.shape_cast %42 : vector<5xf32> to vector<5x1xf32>
    %44 = arith.extui %12 : vector<5x128xi1> to vector<5x128xi32>
    %45 = arith.sitofp %44 : vector<5x128xi32> to vector<5x128xf32>
    %cst_10 = arith.constant dense<0.000000e+00> : vector<5xf32>
    %46 = vector.multi_reduction <add>, %45, %cst_10 [1] : vector<5x128xf32> to vector<5xf32>
    %47 = vector.shape_cast %46 : vector<5xf32> to vector<5x1xf32>
    %48 = vector.broadcast %37 : vector<1x128xi1> to vector<5x128xi1>
    %49 = arith.andi %12, %48 : vector<5x128xi1>
    %cst_11 = arith.constant 1.000000e+00 : f32
    %cst_12 = arith.constant 0.000000e+00 : f32
    %50 = vector.broadcast %cst_11 : f32 to vector<5x128xf32>
    %51 = vector.broadcast %cst_12 : f32 to vector<5x128xf32>
    %52 = arith.select %49, %50, %51 : vector<5x128xi1>, vector<5x128xf32>
    %cst_13 = arith.constant dense<0.000000e+00> : vector<5xf32>
    %53 = vector.multi_reduction <add>, %52, %cst_13 [1] : vector<5x128xf32> to vector<5xf32>
    %54 = vector.shape_cast %53 : vector<5xf32> to vector<5x1xf32>
    %55 = tpu.concatenate %43, %47, %54 in 1 : vector<5x1xf32>, vector<5x1xf32>, vector<5x1xf32> -> vector<5x3xf32>
    %c0_14 = arith.constant 0 : index
    %c0_15 = arith.constant 0 : index
    %c0_16 = arith.constant 0 : index
    %56 = vector.load %arg3[%c0_14, %c0_15, %c0_16] : memref<1x5x3xf32, #tpu.memory_space<vmem>>, vector<1x5x3xf32>
    %57 = vector.shape_cast %56 : vector<1x5x3xf32> to vector<5x3xf32>
    %58 = vector.shape_cast %55 : vector<5x3xf32> to vector<1x5x3xf32>
    tpu.vector_store %arg3[%c0_14, %c0_15, %c0_16], %58 {strides = array<i32>} : memref<1x5x3xf32, #tpu.memory_space<vmem>>, vector<1x5x3xf32>,
    return
  }
  func.func @transform_0(%arg0: i32) -> (i32, i32) {
    %c0_i32 = arith.constant 0 : i32
    %c0_i32_0 = arith.constant 0 : i32
    return %c0_i32, %arg0 : i32, i32
  }
  func.func @transform_1(%arg0: i32) -> (i32, i32) {
    %c0_i32 = arith.constant 0 : i32
    %c0_i32_0 = arith.constant 0 : i32
    return %c0_i32, %arg0 : i32, i32
  }
  func.func @transform_2(%arg0: i32) -> (i32, i32, i32) {
    %c0_i32 = arith.constant 0 : i32
    %c0_i32_0 = arith.constant 0 : i32
    %c0_i32_1 = arith.constant 0 : i32
    return %arg0, %c0_i32, %c0_i32_0 : i32, i32, i32
  }
}

</mosaic_0001>

<bundles_post_ra>
// kernel: _particle_type_loss_impl.1
= control target key start
LH: loop header
LB: loop body
LE: loop exit
PB: predicated region body
PF: predicated region fallthrough
CT: control target
= control target key end

     0   :  { %7 = vsyncpa [#allocation3], 0  ;;  %s149_s9 = smov [#allocation2]   ;;  %s195_s0 = inlined_call_operand.hbm [shape: f32[5,100], index: 0, kind: input, shape index: {}]   ;;  %s196_s1 = inlined_call_operand.vmem [shape: s32[1,100], index: 1, kind: input, shape index: {}]   ;;  %s197_s2 = inlined_call_operand.vmem [shape: f32[1,5,3], index: 2, kind: output, shape index: {}]  }
   0x1   :  { %s14_s10 = sshll.u32 %s149_s9, 4  ;;  %s15_s10 = int_to_ptr.vmem [resolvable:$true] %s14_s10 }
   0x2   :  { %s135_s11 = scalar_lea.vmem %s15_s10, 128  ;;  %p140_p1 = scmp.lt.s32.totalorder %s15_s10, %s15_s10 }
   0x3   :  { %p136_p0 = scmp.ne.s32.totalorder %s15_s10, %s135_s11  ;;  %p141_p2 = scmp.lt.s32.totalorder %s135_s11, %s135_s11 }
   0x5   :  { %p142_p3 = por %p141_p2, %p140_p1 }
   0x7   :  { %p143_p4 = pnand %p142_p3, %p136_p0 }
   0x9   :  { %146 = shalt.err (!%p143_p4)
}
   0xa   :  { %17 = dma.hbm_to_vmem [thread:$0]  %s195_s0, 128, %s15_s10, [#allocation3]  }
   0xb   :  { %147 = dma.done.wait [#allocation3], 128  }
   0xc   :  { %148 = vsyncadd [#allocation3], 4294967168  ;;  %vm40_vm0 = vcmask 1044480   ;;  %v23_v0 = vld [vmem:[#allocation2] sm:$0x1f]  ;;  %v26_v6 = vlaneseq  ;;  %v150_v26 = vmov 0  }
   0xd   :  { %v41_v1 = vsel %vm40_vm0, %v23_v0, -inf  ;;  %v24_v16 = vld [vmem:[%s196_s1] sm:$0x1]  ;;  %v151_v34 = vmov 0.0   ;;  %vm108_vm11 = vcmask 7168   ;;  %vm110_vm12 = vcmask 15360  }
   0xe   :  { %v42_v2 = vrot.slane %v41_v1, 4  ;;  %v33_v9 = vshrl.u32 %v26_v6, 7  ;;  %v27_v12 = vand.u32 127, %v26_v6  ;;  %vm112_vm13 = vcmask 20480  }
  0x10   :  { %v43_v3 = vmax.f32 %v41_v1, %v42_v2  ;;  %vm30_vm3 = vcmp.lt.s32.totalorder %v27_v12, 100  ;;  %v36_v19 = vsub.s32 0, %v33_v9 }
  0x11   :  { %v31_v20 = vsel %vm30_vm3, %v24_v16, 4294967295 }
  0x12   :  { %v44_v4 = vrot.slane %v43_v3, 2  ;;  %v37_v23 = vrot.slane %v31_v20, %v36_v19  ;;  %vm39_vm10 = vcmp.ge.s32.totalorder %v31_v20, 0 }
  0x14   :  { %v45_v5 = vmax.f32 %v43_v3, %v44_v4  ;;  %vm175_vm7 = vcmp.eq.s32.totalorder %v33_v9, %v37_v23 }
  0x15   :  { %v61_v32 = vsel %vm175_vm7, %v23_v0, 0.0  ;;  %v119_v55 = vsel %vm175_vm7, 1.0, %v151_v34 }
  0x16   :  { %v46_v7 = vrot.slane %v45_v5, 1  ;;  %v62_v36 = vsel %vm40_vm0, %v61_v32, 0.0  ;;  %v94_v57 = vsel %vm40_vm0, %v119_v55, 0.0 }
  0x17   :  { %v63_v40 = vrot.slane %v62_v36, 4 }
  0x18   :  { %v47_v8 = vmax.f32 %v45_v5, %v46_v7 }
  0x19   :  { %v64_v43 = vadd.f32 %v63_v40, %v62_v36 }
  0x1a   :  { %v48_v10 = vsub.f32 %v23_v0, %v47_v8  ;;  %vm71_vm1 = vcmp.eq.f32.partialorder %v23_v0, %v47_v8 }
  0x1b   :  { %v72_v11 = vsel %vm71_vm1, %v33_v9, 5  ;;  %v65_v44 = vrot.slane %v64_v43, 2 }
  0x1c   :  { %v49_v13 = vmul.f32 1.442695, %v48_v10  ;;  %v73_v14 = vsel %vm40_vm0, %v72_v11, 2147483647 }
  0x1d   :  { %v74_v15 = vrot.slane %v73_v14, 4  ;;  %v66_v45 = vadd.f32 %v65_v44, %v64_v43 }
  0x1e   :  { %123 = vpow2.f32 %v49_v13 }
  0x1f   :  { %vm75_vm2 = vcmp.lt.s32.totalorder %v73_v14, %v74_v15  ;;  %v67_v46 = vrot.slane %v66_v45, 1 }
  0x20   :  { %v76_v17 = vsel %vm75_vm2, %v73_v14, %v74_v15 }
  0x21   :  { %v77_v18 = vrot.slane %v76_v17, 2  ;;  %v68_v49 = vadd.f32 %v67_v46, %v66_v45 }
  0x23   :  { %vm78_vm4 = vcmp.lt.s32.totalorder %v76_v17, %v77_v18 }
  0x24   :  { %v79_v21 = vsel %vm78_vm4, %v76_v17, %v77_v18 }
  0x25   :  { %v80_v22 = vrot.slane %v79_v21, 1 }
  0x27   :  { %vm81_vm5 = vcmp.lt.s32.totalorder %v79_v21, %v80_v22 }
  0x28   :  { %v82_v24 = vsel %vm81_vm5, %v79_v21, %v80_v22 }
  0x29   :  { %vm83_vm6 = vcmp.eq.s32.totalorder %v82_v24, %v31_v20 }
  0x2a   :  { %v97_v27 = vsel %vm83_vm6, 1, %v150_v26 }
  0x2b   :  { %v124_v28 = vpop.eup %123  ;;  %v101_v29 = vrot.slane %v97_v27, %v36_v19 }
  0x2c   :  { %v51_v30 = vsel %vm40_vm0, %v124_v28, 0.0 }
  0x2d   :  { %v52_v31 = vrot.slane %v51_v30, 4  ;;  %vm102_vm8 = vcmp.eq.s32.totalorder %v101_v29, 1 }
  0x2e   :  { %vm103_vm9 = vmand %vm175_vm7, %vm102_vm8 }
  0x2f   :  { %v53_v33 = vadd.f32 %v52_v31, %v51_v30  ;;  %v104_v35 = vsel %vm103_vm9, 1.0, %v151_v34 }
  0x30   :  { %v105_v37 = vsel %vm40_vm0, %v104_v35, 0.0 }
  0x31   :  { %v54_v38 = vrot.slane %v53_v33, 2  ;;  %106 = vadd.xlane.f32.xlu1 %v105_v37 }
  0x33   :  { %v55_v39 = vadd.f32 %v54_v38, %v53_v33 }
  0x35   :  { %v56_v41 = vrot.slane %v55_v39, 1 }
  0x37   :  { %v57_v42 = vadd.f32 %v56_v41, %v55_v39 }
  0x39   :  { %125 = vlog2.f32 %v57_v42 }
  0x46   :  { %v126_v47 = vpop.eup %125 }
  0x47   :  { %v59_v48 = vmul.f32 0.6931472, %v126_v47 }
  0x49   :  { %v60_v50 = vadd.f32 %v59_v48, %v47_v8 }
  0x4b   :  { %v69_v51 = vsub.f32 %v60_v50, %v68_v49 }
  0x4d   :  { %v70_v52 = vsel %vm39_vm10, %v69_v51, 0.0 }
  0x4e   :  { %v87_v53 = vrot.slane %v70_v52, %v36_v19 }
  0x50   :  { %v88_v54 = vsel %vm175_vm7, %v87_v53, 0.0 }
  0x51   :  { %v89_v56 = vsel %vm40_vm0, %v88_v54, 0.0 }
  0x52   :  { %90 = vadd.xlane.f32.xlu0 %v89_v56 }
  0x56   :  { %95 = vadd.xlane.f32.xlu0 %v94_v57 }
  0xba   :  { %v107_v59 = vpop.xlane.xlu1 %106 }
  0xdb   :  { %v91_v58 = vpop.xlane.xlu0 %90 }
  0xdf   :  { %v96_v60 = vpop.xlane.xlu0 %95 }
  0xe0   :  { %v109_v61 = vsel %vm108_vm11, %v91_v58, %v96_v60 }
  0xe1   :  { %v111_v62 = vsel %vm110_vm12, %v109_v61, %v107_v59 }
  0xe2   :  { %113 = vst.msk [vmem:[%s197_s2] sm:$0x1f] %vm112_vm13, %v111_v62 }
  0xe3   :  { %118 = vsyncpa [#allocation3], 1 }

</bundles_post_ra>
